<compile_context>
chip_gen: v6e
topology: v6e:2x2x1
jax: 0.10.0
libtpu: 0.0.40
codegen_flags: <defaults>
</compile_context>

<pallas_src>
import functools

import jax
import jax.numpy as jnp
import numpy as np
from jax.experimental import pallas as pl
from jax.experimental.pallas import tpu as pltpu


# Sub-pixel taps for ConvTranspose2d(kernel=4, stride=2, padding=1).
# PyTorch: out[o, 2i-1+ky, 2j-1+kx] += sum_c in[c, i, j] * Wd[c, o, ky, kx].
# For output phase (ry, rx) (p = ry*2 + rx) and output base index (a, b), the
# contributing taps are (dh, dw, ky, kx): gather in[a+dh, b+dw] and mix
# channels with Wd[:, :, ky, kx].T .
PHASE_TAPS = (
    ((0, 0, 1, 1), (0, -1, 1, 3), (-1, 0, 3, 1), (-1, -1, 3, 3)),   # (ry=0, rx=0)
    ((0, 1, 1, 0), (0, 0, 1, 2), (-1, 1, 3, 0), (-1, 0, 3, 2)),     # (ry=0, rx=1)
    ((1, 0, 0, 1), (1, -1, 0, 3), (0, 0, 2, 1), (0, -1, 2, 3)),     # (ry=1, rx=0)
    ((1, 1, 0, 0), (1, 0, 0, 2), (0, 1, 2, 0), (0, 0, 2, 2)),       # (ry=1, rx=1)
)


def _decoder_kernel(x_ref, masks_ref, w1_ref, b1_ref, wdec_ref, b2_ref,
                    w3_ref, b3_ref, out_ref, act_ref, *, img_w):
    x = x_ref[0]                                    # (C_in, HW)
    hw = x.shape[-1]
    c_mid = w1_ref.shape[0]

    # conv1 (1x1) + folded BN1 + ReLU  ->  (C_mid, HW)
    y = jnp.dot(w1_ref[...], x, preferred_element_type=jnp.float32) + b1_ref[...]
    y = jnp.maximum(y, 0.0)

    # Hoisted bias broadcast (reused by all 4 phases; JAX does not CSE it).
    b2 = jnp.broadcast_to(b2_ref[...], (c_mid, hw))

    # deconv2 + folded BN2 + ReLU.
    # Each sub-pixel phase p is the sum of 4 tap matmuls applied to y shifted
    # by (dh, dw).  A shift is one XLU roll on the flattened HW axis plus a
    # precomputed boundary-mask multiply; nothing is concatenated and no
    # shifted slab outlives its tap.
    for p in range(4):
        acc = None
        for t, (dh, dw, _ky, _kx) in enumerate(PHASE_TAPS[p]):
            if (dh, dw) == (0, 0):
                ys = y
            else:
                # shifted[:, i] = y[:, i + dh*W + dw]  (zero where invalid)
                shift = (-(dh * img_w + dw)) % hw
                mrow = (dh + 1) * 3 + (dw + 1)
                ys = pltpu.roll(y, shift, 1) * masks_ref[mrow:mrow + 1, :]
            contrib = jnp.dot(wdec_ref[p, t], ys,
                              preferred_element_type=jnp.float32)
            acc = contrib if acc is None else acc + contrib
        # Phase activations land lane-contiguously in the (C_mid, 4*HW)
        # scratch so conv3 can be fused across the phases below.
        act_ref[:, p * hw:(p + 1) * hw] = jnp.maximum(acc + b2, 0.0)

    # conv3 (1x1) + folded BN3 + ReLU, fused over all 4 phases:
    # one (F, C_mid) @ (C_mid, 4*HW) matmul, one lane-dense store.
    z = jnp.dot(w3_ref[...], act_ref[...],
                preferred_element_type=jnp.float32) + b3_ref[...]
    out_ref[0] = jnp.maximum(z, 0.0)


def decoder_forward(x, params):
    """x: (N, C_in, H, W) float32. params: folded params (see fold_params)."""
    n, c_in, h, w = x.shape
    hw = h * w
    c_mid = params["w1"].shape[0]
    f = params["w3"].shape[0]

    x_flat = x.reshape(n, c_in, hw).astype(jnp.float32)

    # Boundary masks for all 9 (dh, dw) shifts on the flattened HW axis,
    # row-major by (dh+1)*3 + (dw+1).  A shifted element is valid iff the
    # (row+dh, col+dw) neighbour exists in the image.
    rows = np.arange(hw) // w
    cols = np.arange(hw) % w
    masks = np.stack([
        ((rows + dh >= 0) & (rows + dh < h) & (cols + dw >= 0) & (cols + dw < w))
        for dh in (-1, 0, 1) for dw in (-1, 0, 1)
    ]).astype(np.float32)
    masks = jnp.asarray(masks)                       # (9, HW)

    def full(shape):
        return pl.BlockSpec(shape, lambda i, _s=shape: (0,) * len(_s))

    grid_spec = pltpu.PrefetchScalarGridSpec(
        num_scalar_prefetch=0,
        grid=(n,),
        in_specs=[
            pl.BlockSpec((1, c_in, hw), lambda i: (i, 0, 0)),
            full((9, hw)),
            full((c_mid, c_in)), full((c_mid, 1)),
            full((4, 4, c_mid, c_mid)), full((c_mid, 1)),
            full((f, c_mid)), full((f, 1)),
        ],
        out_specs=pl.BlockSpec((1, f, 4 * hw), lambda i: (i, 0, 0)),
        scratch_shapes=[pltpu.VMEM((c_mid, 4 * hw), jnp.float32)],
    )
    phases = pl.pallas_call(
        functools.partial(_decoder_kernel, img_w=w),
        out_shape=jax.ShapeDtypeStruct((n, f, 4 * hw), jnp.float32),
        grid_spec=grid_spec,
        compiler_params=pltpu.CompilerParams(
            dimension_semantics=("parallel",)),
    )(x_flat, masks, params["w1"], params["b1"], params["wdec"], params["b2"],
      params["w3"], params["b3"])

    # Interleave the 4 sub-pixel phases -> (N, F, 2H, 2W).  Pure layout work.
    # Columns [p*HW:(p+1)*HW] of the kernel output hold phase p = ry*2 + rx.
    ph = phases.reshape(n, f, 2, 2, h, w)            # (n, f, ry, rx, a, b)
    out = jnp.transpose(ph, (0, 1, 4, 2, 5, 3)).reshape(n, f, 2 * h, 2 * w)
    return out


# ------------------- parameter construction & BN folding ---------------------

def init_raw_params(key, in_channels, n_filters):
    c_mid = in_channels // 4
    ks = jax.random.split(key, 9)

    def uconv(k, shape, fan_in):
        bound = 1.0 / np.sqrt(fan_in)
        return jax.random.uniform(k, shape, jnp.float32, -bound, bound)

    def bn_stats(k, c):
        kg, kb, km, kv = jax.random.split(k, 4)
        gamma = 1.0 + 0.1 * jax.random.normal(kg, (c,), jnp.float32)
        beta = 0.1 * jax.random.normal(kb, (c,), jnp.float32)
        mean = 0.1 * jax.random.normal(km, (c,), jnp.float32)
        var = 0.05 + 0.1 * jax.random.uniform(kv, (c,), jnp.float32)
        return gamma, beta, mean, var

    wc1 = uconv(ks[0], (c_mid, in_channels), in_channels)
    bc1 = uconv(ks[1], (c_mid,), in_channels)
    g1, be1, m1, v1 = bn_stats(ks[2], c_mid)

    wd = uconv(ks[3], (c_mid, c_mid, 4, 4), c_mid * 16)     # (in, out, kh, kw)
    bd = uconv(ks[4], (c_mid,), c_mid * 16)
    g2, be2, m2, v2 = bn_stats(ks[5], c_mid)

    wc3 = uconv(ks[6], (n_filters, c_mid), c_mid)
    bc3 = uconv(ks[7], (n_filters,), c_mid)
    g3, be3, m3, v3 = bn_stats(ks[8], n_filters)

    return dict(wc1=wc1, bc1=bc1, g1=g1, be1=be1, m1=m1, v1=v1,
                wd=wd, bd=bd, g2=g2, be2=be2, m2=m2, v2=v2,
                wc3=wc3, bc3=bc3, g3=g3, be3=be3, m3=m3, v3=v3)


def fold_params(raw, eps=1e-5):
    """Fold eval-mode BatchNorms into the conv weights; build per-tap deconv
    weights wdec[p, t] = Wd[:, :, ky, kx].T (BN2 scale folded per output
    channel), in PHASE_TAPS order."""
    s1 = raw["g1"] / jnp.sqrt(raw["v1"] + eps)
    w1 = raw["wc1"] * s1[:, None]
    b1 = s1 * (raw["bc1"] - raw["m1"]) + raw["be1"]

    s2 = raw["g2"] / jnp.sqrt(raw["v2"] + eps)
    wdec = jnp.stack([
        jnp.stack([raw["wd"][:, :, ky, kx].T * s2[:, None]
                   for (_, _, ky, kx) in taps], axis=0)
        for taps in PHASE_TAPS], axis=0)            # (4, 4, C_mid, C_mid)
    b2 = s2 * (raw["bd"] - raw["m2"]) + raw["be2"]

    s3 = raw["g3"] / jnp.sqrt(raw["v3"] + eps)
    w3 = raw["wc3"] * s3[:, None]
    b3 = s3 * (raw["bc3"] - raw["m3"]) + raw["be3"]

    return {
        "w1": w1.astype(jnp.float32), "b1": b1.reshape(-1, 1).astype(jnp.float32),
        "wdec": wdec.astype(jnp.float32), "b2": b2.reshape(-1, 1).astype(jnp.float32),
        "w3": w3.astype(jnp.float32), "b3": b3.reshape(-1, 1).astype(jnp.float32),
    }


# ------------- independent float64 numpy reference (correctness) -------------

def reference_forward(x, raw, eps=1e-5):
    x = np.asarray(x, np.float64)
    raw = {k: np.asarray(v, np.float64) for k, v in raw.items()}

    def bn(y, g, b, m, v):
        return (g[None, :, None, None] * (y - m[None, :, None, None])
                / np.sqrt(v[None, :, None, None] + eps) + b[None, :, None, None])

    y = np.einsum("oc,nchw->nohw", raw["wc1"], x) + raw["bc1"][None, :, None, None]
    y = np.maximum(bn(y, raw["g1"], raw["be1"], raw["m1"], raw["v1"]), 0.0)

    wd, bd = raw["wd"], raw["bd"]
    n, c, h, w = y.shape
    cout = wd.shape[1]
    up = np.zeros((n, cout, 2 * h, 2 * w), np.float64)
    for ky in range(4):                 # direct ConvTranspose2d(4, 2, 1)
        for kx in range(4):
            t = np.einsum("ncij,co->noij", y, wd[:, :, ky, kx])
            ys = 2 * np.arange(h) - 1 + ky
            xs = 2 * np.arange(w) - 1 + kx
            vy = (ys >= 0) & (ys < 2 * h)
            vx = (xs >= 0) & (xs < 2 * w)
            up[:, :, ys[vy][:, None], xs[vx][None, :]] += t[:, :, vy][:, :, :, vx]
    up += bd[None, :, None, None]
    up = np.maximum(bn(up, raw["g2"], raw["be2"], raw["m2"], raw["v2"]), 0.0)

    z = np.einsum("oc,nchw->nohw", raw["wc3"], up) + raw["bc3"][None, :, None, None]
    z = np.maximum(bn(z, raw["g3"], raw["be3"], raw["m3"], raw["v3"]), 0.0)
    return z


if __name__ == "__main__":
    key = jax.random.PRNGKey(0)
    k_x, k_p = jax.random.split(key)

    N, C_in, H, W = 2, 32, 16, 16       # in_channels=32 -> C_mid=8
    n_filters = 16
    x = jax.random.normal(k_x, (N, C_in, H, W), jnp.float32)
    raw = init_raw_params(k_p, C_in, n_filters)
    params = fold_params(raw)

    out = decoder_forward(x, params)
    out = jax.block_until_ready(out)
    assert out.shape == (N, n_filters, 2 * H, 2 * W)

    ref = reference_forward(np.asarray(x), raw)
    np.testing.assert_allclose(np.asarray(out), ref, rtol=5e-3, atol=5e-3)
    print("KERNEL_OK")
</pallas_src>

<mosaic_0001>
module attributes {stable_mosaic.version = 11 : i64} {
  func.func @_decoder_kernel(%arg0: i32, %arg1: memref<1x32x256xf32, #tpu.memory_space<vmem>>, %arg2: memref<9x256xf32, #tpu.memory_space<vmem>>, %arg3: memref<8x32xf32, #tpu.memory_space<vmem>>, %arg4: memref<8x1xf32, #tpu.memory_space<vmem>>, %arg5: memref<4x4x8x8xf32, #tpu.memory_space<vmem>>, %arg6: memref<8x1xf32, #tpu.memory_space<vmem>>, %arg7: memref<16x8xf32, #tpu.memory_space<vmem>>, %arg8: memref<16x1xf32, #tpu.memory_space<vmem>>, %arg9: memref<1x16x1024xf32, #tpu.memory_space<vmem>>, %arg10: memref<8x1024xf32, #tpu.memory_space<vmem>>) attributes {dimension_semantics = [#tpu.dimension_semantics<parallel>], iteration_bounds = array<i64: 2>, scalar_prefetch = 0 : i64, scratch_operands = 1 : i64, tpu.core_type = #tpu.core_type<tc>, window_params = [{transform_indices = @transform_0, window_bounds = array<i64: 1, 32, 256>}, {pipeline_mode = #tpu.pipeline_mode<synchronous>, transform_indices = @transform_1, window_bounds = array<i64: 9, 256>}, {pipeline_mode = #tpu.pipeline_mode<synchronous>, transform_indices = @transform_2, window_bounds = array<i64: 8, 32>}, {pipeline_mode = #tpu.pipeline_mode<synchronous>, transform_indices = @transform_3, window_bounds = array<i64: 8, 1>}, {pipeline_mode = #tpu.pipeline_mode<synchronous>, transform_indices = @transform_4, window_bounds = array<i64: 4, 4, 8, 8>}, {pipeline_mode = #tpu.pipeline_mode<synchronous>, transform_indices = @transform_5, window_bounds = array<i64: 8, 1>}, {pipeline_mode = #tpu.pipeline_mode<synchronous>, transform_indices = @transform_6, window_bounds = array<i64: 16, 8>}, {pipeline_mode = #tpu.pipeline_mode<synchronous>, transform_indices = @transform_7, window_bounds = array<i64: 16, 1>}, {transform_indices = @transform_8, window_bounds = array<i64: 1, 16, 1024>}]} {
    %c0 = arith.constant 0 : index
    %c0_0 = arith.constant 0 : index
    %c0_1 = arith.constant 0 : index
    %0 = vector.load %arg1[%c0, %c0_0, %c0_1] : memref<1x32x256xf32, #tpu.memory_space<vmem>>, vector<1x32x256xf32>
    %1 = vector.shape_cast %0 : vector<1x32x256xf32> to vector<32x256xf32>
    %c0_2 = arith.constant 0 : index
    %c0_3 = arith.constant 0 : index
    %2 = vector.load %arg3[%c0_2, %c0_3] : memref<8x32xf32, #tpu.memory_space<vmem>>, vector<8x32xf32>
    %cst = arith.constant dense<0.000000e+00> : vector<8x256xf32>
    %3 = tpu.matmul %2, %1, %cst {dimension_numbers = #tpu.dot_dimension_numbers<[1], [0], [0], [1], [0, 0, 1, 1], [], []>} : vector<8x32xf32>, vector<32x256xf32>, vector<8x256xf32> -> vector<8x256xf32>
    %c0_4 = arith.constant 0 : index
    %c0_5 = arith.constant 0 : index
    %4 = vector.load %arg4[%c0_4, %c0_5] : memref<8x1xf32, #tpu.memory_space<vmem>>, vector<8x1xf32>
    %5 = vector.broadcast %4 : vector<8x1xf32> to vector<8x256xf32>
    %6 = arith.addf %3, %5 : vector<8x256xf32>
    %cst_6 = arith.constant 0.000000e+00 : f32
    %7 = vector.broadcast %cst_6 : f32 to vector<8x256xf32>
    %8 = arith.maximumf %6, %7 : vector<8x256xf32>
    %c0_7 = arith.constant 0 : index
    %c0_8 = arith.constant 0 : index
    %9 = vector.load %arg6[%c0_7, %c0_8] : memref<8x1xf32, #tpu.memory_space<vmem>>, vector<8x1xf32>
    %10 = vector.shape_cast %9 : vector<8x1xf32> to vector<8x1xf32>
    %11 = vector.broadcast %10 : vector<8x1xf32> to vector<8x256xf32>
    %c0_9 = arith.constant 0 : index
    %c0_10 = arith.constant 0 : index
    %c0_11 = arith.constant 0 : index
    %c0_12 = arith.constant 0 : index
    %12 = vector.load %arg5[%c0_9, %c0_10, %c0_11, %c0_12] : memref<4x4x8x8xf32, #tpu.memory_space<vmem>>, vector<1x1x8x8xf32>
    %13 = vector.shape_cast %12 : vector<1x1x8x8xf32> to vector<8x8xf32>
    %cst_13 = arith.constant dense<0.000000e+00> : vector<8x256xf32>
    %14 = tpu.matmul %13, %8, %cst_13 {dimension_numbers = #tpu.dot_dimension_numbers<[1], [0], [0], [1], [0, 0, 1, 1], [], []>} : vector<8x8xf32>, vector<8x256xf32>, vector<8x256xf32> -> vector<8x256xf32>
    %c1_i32 = arith.constant 1 : i32
    %15 = tpu.dynamic_rotate %8 by %c1_i32 dim 1 : vector<8x256xf32>, i32 -> vector<8x256xf32>
    %c3 = arith.constant 3 : index
    %c0_14 = arith.constant 0 : index
    %16 = vector.load %arg2[%c3, %c0_14] : memref<9x256xf32, #tpu.memory_space<vmem>>, vector<1x256xf32>
    %17 = vector.broadcast %16 : vector<1x256xf32> to vector<8x256xf32>
    %18 = arith.mulf %15, %17 : vector<8x256xf32>
    %c0_15 = arith.constant 0 : index
    %c1 = arith.constant 1 : index
    %c0_16 = arith.constant 0 : index
    %c0_17 = arith.constant 0 : index
    %19 = vector.load %arg5[%c0_15, %c1, %c0_16, %c0_17] : memref<4x4x8x8xf32, #tpu.memory_space<vmem>>, vector<1x1x8x8xf32>
    %20 = vector.shape_cast %19 : vector<1x1x8x8xf32> to vector<8x8xf32>
    %cst_18 = arith.constant dense<0.000000e+00> : vector<8x256xf32>
    %21 = tpu.matmul %20, %18, %cst_18 {dimension_numbers = #tpu.dot_dimension_numbers<[1], [0], [0], [1], [0, 0, 1, 1], [], []>} : vector<8x8xf32>, vector<8x256xf32>, vector<8x256xf32> -> vector<8x256xf32>
    %22 = arith.addf %14, %21 : vector<8x256xf32>
    %c16_i32 = arith.constant 16 : i32
    %23 = tpu.dynamic_rotate %8 by %c16_i32 dim 1 : vector<8x256xf32>, i32 -> vector<8x256xf32>
    %c1_19 = arith.constant 1 : index
    %c0_20 = arith.constant 0 : index
    %24 = vector.load %arg2[%c1_19, %c0_20] : memref<9x256xf32, #tpu.memory_space<vmem>>, vector<1x256xf32>
    %25 = vector.broadcast %24 : vector<1x256xf32> to vector<8x256xf32>
    %26 = arith.mulf %23, %25 : vector<8x256xf32>
    %c0_21 = arith.constant 0 : index
    %c2 = arith.constant 2 : index
    %c0_22 = arith.constant 0 : index
    %c0_23 = arith.constant 0 : index
    %27 = vector.load %arg5[%c0_21, %c2, %c0_22, %c0_23] : memref<4x4x8x8xf32, #tpu.memory_space<vmem>>, vector<1x1x8x8xf32>
    %28 = vector.shape_cast %27 : vector<1x1x8x8xf32> to vector<8x8xf32>
    %cst_24 = arith.constant dense<0.000000e+00> : vector<8x256xf32>
    %29 = tpu.matmul %28, %26, %cst_24 {dimension_numbers = #tpu.dot_dimension_numbers<[1], [0], [0], [1], [0, 0, 1, 1], [], []>} : vector<8x8xf32>, vector<8x256xf32>, vector<8x256xf32> -> vector<8x256xf32>
    %30 = arith.addf %22, %29 : vector<8x256xf32>
    %c17_i32 = arith.constant 17 : i32
    %31 = tpu.dynamic_rotate %8 by %c17_i32 dim 1 : vector<8x256xf32>, i32 -> vector<8x256xf32>
    %c0_25 = arith.constant 0 : index
    %c0_26 = arith.constant 0 : index
    %32 = vector.load %arg2[%c0_25, %c0_26] : memref<9x256xf32, #tpu.memory_space<vmem>>, vector<1x256xf32>
    %33 = vector.broadcast %32 : vector<1x256xf32> to vector<8x256xf32>
    %34 = arith.mulf %31, %33 : vector<8x256xf32>
    %c0_27 = arith.constant 0 : index
    %c3_28 = arith.constant 3 : index
    %c0_29 = arith.constant 0 : index
    %c0_30 = arith.constant 0 : index
    %35 = vector.load %arg5[%c0_27, %c3_28, %c0_29, %c0_30] : memref<4x4x8x8xf32, #tpu.memory_space<vmem>>, vector<1x1x8x8xf32>
    %36 = vector.shape_cast %35 : vector<1x1x8x8xf32> to vector<8x8xf32>
    %cst_31 = arith.constant dense<0.000000e+00> : vector<8x256xf32>
    %37 = tpu.matmul %36, %34, %cst_31 {dimension_numbers = #tpu.dot_dimension_numbers<[1], [0], [0], [1], [0, 0, 1, 1], [], []>} : vector<8x8xf32>, vector<8x256xf32>, vector<8x256xf32> -> vector<8x256xf32>
    %38 = arith.addf %30, %37 : vector<8x256xf32>
    %39 = arith.addf %38, %11 : vector<8x256xf32>
    %cst_32 = arith.constant 0.000000e+00 : f32
    %40 = vector.broadcast %cst_32 : f32 to vector<8x256xf32>
    %41 = arith.maximumf %39, %40 : vector<8x256xf32>
    %c0_33 = arith.constant 0 : index
    %c0_34 = arith.constant 0 : index
    %42 = vector.load %arg10[%c0_33, %c0_34] : memref<8x1024xf32, #tpu.memory_space<vmem>>, vector<8x256xf32>
    tpu.vector_store %arg10[%c0_33, %c0_34], %41 {strides = array<i32>} : memref<8x1024xf32, #tpu.memory_space<vmem>>, vector<8x256xf32>,
    %c255_i32 = arith.constant 255 : i32
    %43 = tpu.dynamic_rotate %8 by %c255_i32 dim 1 : vector<8x256xf32>, i32 -> vector<8x256xf32>
    %c5 = arith.constant 5 : index
    %c0_35 = arith.constant 0 : index
    %44 = vector.load %arg2[%c5, %c0_35] : memref<9x256xf32, #tpu.memory_space<vmem>>, vector<1x256xf32>
    %45 = vector.broadcast %44 : vector<1x256xf32> to vector<8x256xf32>
    %46 = arith.mulf %43, %45 : vector<8x256xf32>
    %c1_36 = arith.constant 1 : index
    %c0_37 = arith.constant 0 : index
    %c0_38 = arith.constant 0 : index
    %c0_39 = arith.constant 0 : index
    %47 = vector.load %arg5[%c1_36, %c0_37, %c0_38, %c0_39] : memref<4x4x8x8xf32, #tpu.memory_space<vmem>>, vector<1x1x8x8xf32>
    %48 = vector.shape_cast %47 : vector<1x1x8x8xf32> to vector<8x8xf32>
    %cst_40 = arith.constant dense<0.000000e+00> : vector<8x256xf32>
    %49 = tpu.matmul %48, %46, %cst_40 {dimension_numbers = #tpu.dot_dimension_numbers<[1], [0], [0], [1], [0, 0, 1, 1], [], []>} : vector<8x8xf32>, vector<8x256xf32>, vector<8x256xf32> -> vector<8x256xf32>
    %c1_41 = arith.constant 1 : index
    %c1_42 = arith.constant 1 : index
    %c0_43 = arith.constant 0 : index
    %c0_44 = arith.constant 0 : index
    %50 = vector.load %arg5[%c1_41, %c1_42, %c0_43, %c0_44] : memref<4x4x8x8xf32, #tpu.memory_space<vmem>>, vector<1x1x8x8xf32>
    %51 = vector.shape_cast %50 : vector<1x1x8x8xf32> to vector<8x8xf32>
    %cst_45 = arith.constant dense<0.000000e+00> : vector<8x256xf32>
    %52 = tpu.matmul %51, %8, %cst_45 {dimension_numbers = #tpu.dot_dimension_numbers<[1], [0], [0], [1], [0, 0, 1, 1], [], []>} : vector<8x8xf32>, vector<8x256xf32>, vector<8x256xf32> -> vector<8x256xf32>
    %53 = arith.addf %49, %52 : vector<8x256xf32>
    %c15_i32 = arith.constant 15 : i32
    %54 = tpu.dynamic_rotate %8 by %c15_i32 dim 1 : vector<8x256xf32>, i32 -> vector<8x256xf32>
    %c2_46 = arith.constant 2 : index
    %c0_47 = arith.constant 0 : index
    %55 = vector.load %arg2[%c2_46, %c0_47] : memref<9x256xf32, #tpu.memory_space<vmem>>, vector<1x256xf32>
    %56 = vector.broadcast %55 : vector<1x256xf32> to vector<8x256xf32>
    %57 = arith.mulf %54, %56 : vector<8x256xf32>
    %c1_48 = arith.constant 1 : index
    %c2_49 = arith.constant 2 : index
    %c0_50 = arith.constant 0 : index
    %c0_51 = arith.constant 0 : index
    %58 = vector.load %arg5[%c1_48, %c2_49, %c0_50, %c0_51] : memref<4x4x8x8xf32, #tpu.memory_space<vmem>>, vector<1x1x8x8xf32>
    %59 = vector.shape_cast %58 : vector<1x1x8x8xf32> to vector<8x8xf32>
    %cst_52 = arith.constant dense<0.000000e+00> : vector<8x256xf32>
    %60 = tpu.matmul %59, %57, %cst_52 {dimension_numbers = #tpu.dot_dimension_numbers<[1], [0], [0], [1], [0, 0, 1, 1], [], []>} : vector<8x8xf32>, vector<8x256xf32>, vector<8x256xf32> -> vector<8x256xf32>
    %61 = arith.addf %53, %60 : vector<8x256xf32>
    %c16_i32_53 = arith.constant 16 : i32
    %62 = tpu.dynamic_rotate %8 by %c16_i32_53 dim 1 : vector<8x256xf32>, i32 -> vector<8x256xf32>
    %c1_54 = arith.constant 1 : index
    %c0_55 = arith.constant 0 : index
    %63 = vector.load %arg2[%c1_54, %c0_55] : memref<9x256xf32, #tpu.memory_space<vmem>>, vector<1x256xf32>
    %64 = vector.broadcast %63 : vector<1x256xf32> to vector<8x256xf32>
    %65 = arith.mulf %62, %64 : vector<8x256xf32>
    %c1_56 = arith.constant 1 : index
    %c3_57 = arith.constant 3 : index
    %c0_58 = arith.constant 0 : index
    %c0_59 = arith.constant 0 : index
    %66 = vector.load %arg5[%c1_56, %c3_57, %c0_58, %c0_59] : memref<4x4x8x8xf32, #tpu.memory_space<vmem>>, vector<1x1x8x8xf32>
    %67 = vector.shape_cast %66 : vector<1x1x8x8xf32> to vector<8x8xf32>
    %cst_60 = arith.constant dense<0.000000e+00> : vector<8x256xf32>
    %68 = tpu.matmul %67, %65, %cst_60 {dimension_numbers = #tpu.dot_dimension_numbers<[1], [0], [0], [1], [0, 0, 1, 1], [], []>} : vector<8x8xf32>, vector<8x256xf32>, vector<8x256xf32> -> vector<8x256xf32>
    %69 = arith.addf %61, %68 : vector<8x256xf32>
    %70 = arith.addf %69, %11 : vector<8x256xf32>
    %cst_61 = arith.constant 0.000000e+00 : f32
    %71 = vector.broadcast %cst_61 : f32 to vector<8x256xf32>
    %72 = arith.maximumf %70, %71 : vector<8x256xf32>
    %c0_62 = arith.constant 0 : index
    %c256 = arith.constant 256 : index
    %73 = vector.load %arg10[%c0_62, %c256] : memref<8x1024xf32, #tpu.memory_space<vmem>>, vector<8x256xf32>
    tpu.vector_store %arg10[%c0_62, %c256], %72 {strides = array<i32>} : memref<8x1024xf32, #tpu.memory_space<vmem>>, vector<8x256xf32>,
    %c240_i32 = arith.constant 240 : i32
    %74 = tpu.dynamic_rotate %8 by %c240_i32 dim 1 : vector<8x256xf32>, i32 -> vector<8x256xf32>
    %c7 = arith.constant 7 : index
    %c0_63 = arith.constant 0 : index
    %75 = vector.load %arg2[%c7, %c0_63] : memref<9x256xf32, #tpu.memory_space<vmem>>, vector<1x256xf32>
    %76 = vector.broadcast %75 : vector<1x256xf32> to vector<8x256xf32>
    %77 = arith.mulf %74, %76 : vector<8x256xf32>
    %c2_64 = arith.constant 2 : index
    %c0_65 = arith.constant 0 : index
    %c0_66 = arith.constant 0 : index
    %c0_67 = arith.constant 0 : index
    %78 = vector.load %arg5[%c2_64, %c0_65, %c0_66, %c0_67] : memref<4x4x8x8xf32, #tpu.memory_space<vmem>>, vector<1x1x8x8xf32>
    %79 = vector.shape_cast %78 : vector<1x1x8x8xf32> to vector<8x8xf32>
    %cst_68 = arith.constant dense<0.000000e+00> : vector<8x256xf32>
    %80 = tpu.matmul %79, %77, %cst_68 {dimension_numbers = #tpu.dot_dimension_numbers<[1], [0], [0], [1], [0, 0, 1, 1], [], []>} : vector<8x8xf32>, vector<8x256xf32>, vector<8x256xf32> -> vector<8x256xf32>
    %c241_i32 = arith.constant 241 : i32
    %81 = tpu.dynamic_rotate %8 by %c241_i32 dim 1 : vector<8x256xf32>, i32 -> vector<8x256xf32>
    %c6 = arith.constant 6 : index
    %c0_69 = arith.constant 0 : index
    %82 = vector.load %arg2[%c6, %c0_69] : memref<9x256xf32, #tpu.memory_space<vmem>>, vector<1x256xf32>
    %83 = vector.broadcast %82 : vector<1x256xf32> to vector<8x256xf32>
    %84 = arith.mulf %81, %83 : vector<8x256xf32>
    %c2_70 = arith.constant 2 : index
    %c1_71 = arith.constant 1 : index
    %c0_72 = arith.constant 0 : index
    %c0_73 = arith.constant 0 : index
    %85 = vector.load %arg5[%c2_70, %c1_71, %c0_72, %c0_73] : memref<4x4x8x8xf32, #tpu.memory_space<vmem>>, vector<1x1x8x8xf32>
    %86 = vector.shape_cast %85 : vector<1x1x8x8xf32> to vector<8x8xf32>
    %cst_74 = arith.constant dense<0.000000e+00> : vector<8x256xf32>
    %87 = tpu.matmul %86, %84, %cst_74 {dimension_numbers = #tpu.dot_dimension_numbers<[1], [0], [0], [1], [0, 0, 1, 1], [], []>} : vector<8x8xf32>, vector<8x256xf32>, vector<8x256xf32> -> vector<8x256xf32>
    %88 = arith.addf %80, %87 : vector<8x256xf32>
    %c2_75 = arith.constant 2 : index
    %c2_76 = arith.constant 2 : index
    %c0_77 = arith.constant 0 : index
    %c0_78 = arith.constant 0 : index
    %89 = vector.load %arg5[%c2_75, %c2_76, %c0_77, %c0_78] : memref<4x4x8x8xf32, #tpu.memory_space<vmem>>, vector<1x1x8x8xf32>
    %90 = vector.shape_cast %89 : vector<1x1x8x8xf32> to vector<8x8xf32>
    %cst_79 = arith.constant dense<0.000000e+00> : vector<8x256xf32>
    %91 = tpu.matmul %90, %8, %cst_79 {dimension_numbers = #tpu.dot_dimension_numbers<[1], [0], [0], [1], [0, 0, 1, 1], [], []>} : vector<8x8xf32>, vector<8x256xf32>, vector<8x256xf32> -> vector<8x256xf32>
    %92 = arith.addf %88, %91 : vector<8x256xf32>
    %c1_i32_80 = arith.constant 1 : i32
    %93 = tpu.dynamic_rotate %8 by %c1_i32_80 dim 1 : vector<8x256xf32>, i32 -> vector<8x256xf32>
    %c3_81 = arith.constant 3 : index
    %c0_82 = arith.constant 0 : index
    %94 = vector.load %arg2[%c3_81, %c0_82] : memref<9x256xf32, #tpu.memory_space<vmem>>, vector<1x256xf32>
    %95 = vector.broadcast %94 : vector<1x256xf32> to vector<8x256xf32>
    %96 = arith.mulf %93, %95 : vector<8x256xf32>
    %c2_83 = arith.constant 2 : index
    %c3_84 = arith.constant 3 : index
    %c0_85 = arith.constant 0 : index
    %c0_86 = arith.constant 0 : index
    %97 = vector.load %arg5[%c2_83, %c3_84, %c0_85, %c0_86] : memref<4x4x8x8xf32, #tpu.memory_space<vmem>>, vector<1x1x8x8xf32>
    %98 = vector.shape_cast %97 : vector<1x1x8x8xf32> to vector<8x8xf32>
    %cst_87 = arith.constant dense<0.000000e+00> : vector<8x256xf32>
    %99 = tpu.matmul %98, %96, %cst_87 {dimension_numbers = #tpu.dot_dimension_numbers<[1], [0], [0], [1], [0, 0, 1, 1], [], []>} : vector<8x8xf32>, vector<8x256xf32>, vector<8x256xf32> -> vector<8x256xf32>
    %100 = arith.addf %92, %99 : vector<8x256xf32>
    %101 = arith.addf %100, %11 : vector<8x256xf32>
    %cst_88 = arith.constant 0.000000e+00 : f32
    %102 = vector.broadcast %cst_88 : f32 to vector<8x256xf32>
    %103 = arith.maximumf %101, %102 : vector<8x256xf32>
    %c0_89 = arith.constant 0 : index
    %c512 = arith.constant 512 : index
    %104 = vector.load %arg10[%c0_89, %c512] : memref<8x1024xf32, #tpu.memory_space<vmem>>, vector<8x256xf32>
    tpu.vector_store %arg10[%c0_89, %c512], %103 {strides = array<i32>} : memref<8x1024xf32, #tpu.memory_space<vmem>>, vector<8x256xf32>,
    %c239_i32 = arith.constant 239 : i32
    %105 = tpu.dynamic_rotate %8 by %c239_i32 dim 1 : vector<8x256xf32>, i32 -> vector<8x256xf32>
    %c8 = arith.constant 8 : index
    %c0_90 = arith.constant 0 : index
    %106 = vector.load %arg2[%c8, %c0_90] : memref<9x256xf32, #tpu.memory_space<vmem>>, vector<1x256xf32>
    %107 = vector.broadcast %106 : vector<1x256xf32> to vector<8x256xf32>
    %108 = arith.mulf %105, %107 : vector<8x256xf32>
    %c3_91 = arith.constant 3 : index
    %c0_92 = arith.constant 0 : index
    %c0_93 = arith.constant 0 : index
    %c0_94 = arith.constant 0 : index
    %109 = vector.load %arg5[%c3_91, %c0_92, %c0_93, %c0_94] : memref<4x4x8x8xf32, #tpu.memory_space<vmem>>, vector<1x1x8x8xf32>
    %110 = vector.shape_cast %109 : vector<1x1x8x8xf32> to vector<8x8xf32>
    %cst_95 = arith.constant dense<0.000000e+00> : vector<8x256xf32>
    %111 = tpu.matmul %110, %108, %cst_95 {dimension_numbers = #tpu.dot_dimension_numbers<[1], [0], [0], [1], [0, 0, 1, 1], [], []>} : vector<8x8xf32>, vector<8x256xf32>, vector<8x256xf32> -> vector<8x256xf32>
    %c240_i32_96 = arith.constant 240 : i32
    %112 = tpu.dynamic_rotate %8 by %c240_i32_96 dim 1 : vector<8x256xf32>, i32 -> vector<8x256xf32>
    %c7_97 = arith.constant 7 : index
    %c0_98 = arith.constant 0 : index
    %113 = vector.load %arg2[%c7_97, %c0_98] : memref<9x256xf32, #tpu.memory_space<vmem>>, vector<1x256xf32>
    %114 = vector.broadcast %113 : vector<1x256xf32> to vector<8x256xf32>
    %115 = arith.mulf %112, %114 : vector<8x256xf32>
    %c3_99 = arith.constant 3 : index
    %c1_100 = arith.constant 1 : index
    %c0_101 = arith.constant 0 : index
    %c0_102 = arith.constant 0 : index
    %116 = vector.load %arg5[%c3_99, %c1_100, %c0_101, %c0_102] : memref<4x4x8x8xf32, #tpu.memory_space<vmem>>, vector<1x1x8x8xf32>
    %117 = vector.shape_cast %116 : vector<1x1x8x8xf32> to vector<8x8xf32>
    %cst_103 = arith.constant dense<0.000000e+00> : vector<8x256xf32>
    %118 = tpu.matmul %117, %115, %cst_103 {dimension_numbers = #tpu.dot_dimension_numbers<[1], [0], [0], [1], [0, 0, 1, 1], [], []>} : vector<8x8xf32>, vector<8x256xf32>, vector<8x256xf32> -> vector<8x256xf32>
    %119 = arith.addf %111, %118 : vector<8x256xf32>
    %c255_i32_104 = arith.constant 255 : i32
    %120 = tpu.dynamic_rotate %8 by %c255_i32_104 dim 1 : vector<8x256xf32>, i32 -> vector<8x256xf32>
    %c5_105 = arith.constant 5 : index
    %c0_106 = arith.constant 0 : index
    %121 = vector.load %arg2[%c5_105, %c0_106] : memref<9x256xf32, #tpu.memory_space<vmem>>, vector<1x256xf32>
    %122 = vector.broadcast %121 : vector<1x256xf32> to vector<8x256xf32>
    %123 = arith.mulf %120, %122 : vector<8x256xf32>
    %c3_107 = arith.constant 3 : index
    %c2_108 = arith.constant 2 : index
    %c0_109 = arith.constant 0 : index
    %c0_110 = arith.constant 0 : index
    %124 = vector.load %arg5[%c3_107, %c2_108, %c0_109, %c0_110] : memref<4x4x8x8xf32, #tpu.memory_space<vmem>>, vector<1x1x8x8xf32>
    %125 = vector.shape_cast %124 : vector<1x1x8x8xf32> to vector<8x8xf32>
    %cst_111 = arith.constant dense<0.000000e+00> : vector<8x256xf32>
    %126 = tpu.matmul %125, %123, %cst_111 {dimension_numbers = #tpu.dot_dimension_numbers<[1], [0], [0], [1], [0, 0, 1, 1], [], []>} : vector<8x8xf32>, vector<8x256xf32>, vector<8x256xf32> -> vector<8x256xf32>
    %127 = arith.addf %119, %126 : vector<8x256xf32>
    %c3_112 = arith.constant 3 : index
    %c3_113 = arith.constant 3 : index
    %c0_114 = arith.constant 0 : index
    %c0_115 = arith.constant 0 : index
    %128 = vector.load %arg5[%c3_112, %c3_113, %c0_114, %c0_115] : memref<4x4x8x8xf32, #tpu.memory_space<vmem>>, vector<1x1x8x8xf32>
    %129 = vector.shape_cast %128 : vector<1x1x8x8xf32> to vector<8x8xf32>
    %cst_116 = arith.constant dense<0.000000e+00> : vector<8x256xf32>
    %130 = tpu.matmul %129, %8, %cst_116 {dimension_numbers = #tpu.dot_dimension_numbers<[1], [0], [0], [1], [0, 0, 1, 1], [], []>} : vector<8x8xf32>, vector<8x256xf32>, vector<8x256xf32> -> vector<8x256xf32>
    %131 = arith.addf %127, %130 : vector<8x256xf32>
    %132 = arith.addf %131, %11 : vector<8x256xf32>
    %cst_117 = arith.constant 0.000000e+00 : f32
    %133 = vector.broadcast %cst_117 : f32 to vector<8x256xf32>
    %134 = arith.maximumf %132, %133 : vector<8x256xf32>
    %c0_118 = arith.constant 0 : index
    %c768 = arith.constant 768 : index
    %135 = vector.load %arg10[%c0_118, %c768] : memref<8x1024xf32, #tpu.memory_space<vmem>>, vector<8x256xf32>
    tpu.vector_store %arg10[%c0_118, %c768], %134 {strides = array<i32>} : memref<8x1024xf32, #tpu.memory_space<vmem>>, vector<8x256xf32>,
    %c0_119 = arith.constant 0 : index
    %c0_120 = arith.constant 0 : index
    %136 = vector.load %arg7[%c0_119, %c0_120] : memref<16x8xf32, #tpu.memory_space<vmem>>, vector<16x8xf32>
    %c0_121 = arith.constant 0 : index
    %c0_122 = arith.constant 0 : index
    %137 = vector.load %arg10[%c0_121, %c0_122] : memref<8x1024xf32, #tpu.memory_space<vmem>>, vector<8x1024xf32>
    %cst_123 = arith.constant dense<0.000000e+00> : vector<16x1024xf32>
    %138 = tpu.matmul %136, %137, %cst_123 {dimension_numbers = #tpu.dot_dimension_numbers<[1], [0], [0], [1], [0, 0, 1, 1], [], []>} : vector<16x8xf32>, vector<8x1024xf32>, vector<16x1024xf32> -> vector<16x1024xf32>
    %c0_124 = arith.constant 0 : index
    %c0_125 = arith.constant 0 : index
    %139 = vector.load %arg8[%c0_124, %c0_125] : memref<16x1xf32, #tpu.memory_space<vmem>>, vector<16x1xf32>
    %140 = vector.broadcast %139 : vector<16x1xf32> to vector<16x1024xf32>
    %141 = arith.addf %138, %140 : vector<16x1024xf32>
    %cst_126 = arith.constant 0.000000e+00 : f32
    %142 = vector.broadcast %cst_126 : f32 to vector<16x1024xf32>
    %143 = arith.maximumf %141, %142 : vector<16x1024xf32>
    %c0_127 = arith.constant 0 : index
    %c0_128 = arith.constant 0 : index
    %c0_129 = arith.constant 0 : index
    %144 = vector.load %arg9[%c0_127, %c0_128, %c0_129] : memref<1x16x1024xf32, #tpu.memory_space<vmem>>, vector<1x16x1024xf32>
    %145 = vector.shape_cast %144 : vector<1x16x1024xf32> to vector<16x1024xf32>
    %146 = vector.shape_cast %143 : vector<16x1024xf32> to vector<1x16x1024xf32>
    tpu.vector_store %arg9[%c0_127, %c0_128, %c0_129], %146 {strides = array<i32>} : memref<1x16x1024xf32, #tpu.memory_space<vmem>>, vector<1x16x1024xf32>,
    return
  }
  func.func @transform_0(%arg0: i32) -> (i32, i32, i32) {
    %c0_i32 = arith.constant 0 : i32
    %c0_i32_0 = arith.constant 0 : i32
    %c0_i32_1 = arith.constant 0 : i32
    return %arg0, %c0_i32, %c0_i32_0 : i32, i32, i32
  }
  func.func @transform_1(%arg0: i32) -> (i32, i32) {
    %c0_i32 = arith.constant 0 : i32
    %c0_i32_0 = arith.constant 0 : i32
    %c0_i32_1 = arith.constant 0 : i32
    return %c0_i32, %c0_i32_0 : i32, i32
  }
  func.func @transform_2(%arg0: i32) -> (i32, i32) {
    %c0_i32 = arith.constant 0 : i32
    %c0_i32_0 = arith.constant 0 : i32
    %c0_i32_1 = arith.constant 0 : i32
    return %c0_i32, %c0_i32_0 : i32, i32
  }
  func.func @transform_3(%arg0: i32) -> (i32, i32) {
    %c0_i32 = arith.constant 0 : i32
    %c0_i32_0 = arith.constant 0 : i32
    %c0_i32_1 = arith.constant 0 : i32
    return %c0_i32, %c0_i32_0 : i32, i32
  }
  func.func @transform_4(%arg0: i32) -> (i32, i32, i32, i32) {
    %c0_i32 = arith.constant 0 : i32
    %c0_i32_0 = arith.constant 0 : i32
    %c0_i32_1 = arith.constant 0 : i32
    %c0_i32_2 = arith.constant 0 : i32
    %c0_i32_3 = arith.constant 0 : i32
    return %c0_i32, %c0_i32_0, %c0_i32_1, %c0_i32_2 : i32, i32, i32, i32
  }
  func.func @transform_5(%arg0: i32) -> (i32, i32) {
    %c0_i32 = arith.constant 0 : i32
    %c0_i32_0 = arith.constant 0 : i32
    %c0_i32_1 = arith.constant 0 : i32
    return %c0_i32, %c0_i32_0 : i32, i32
  }
  func.func @transform_6(%arg0: i32) -> (i32, i32) {
    %c0_i32 = arith.constant 0 : i32
    %c0_i32_0 = arith.constant 0 : i32
    %c0_i32_1 = arith.constant 0 : i32
    return %c0_i32, %c0_i32_0 : i32, i32
  }
  func.func @transform_7(%arg0: i32) -> (i32, i32) {
    %c0_i32 = arith.constant 0 : i32
    %c0_i32_0 = arith.constant 0 : i32
    %c0_i32_1 = arith.constant 0 : i32
    return %c0_i32, %c0_i32_0 : i32, i32
  }
  func.func @transform_8(%arg0: i32) -> (i32, i32, i32) {
    %c0_i32 = arith.constant 0 : i32
    %c0_i32_0 = arith.constant 0 : i32
    %c0_i32_1 = arith.constant 0 : i32
    return %arg0, %c0_i32, %c0_i32_0 : i32, i32, i32
  }
}

</mosaic_0001>

<bundles_post_ra>
// kernel: tpu_custom_call.1
= control target key start
LH: loop header
LB: loop body
LE: loop exit
PB: predicated region body
PF: predicated region fallthrough
CT: control target
= control target key end

     0   :  { %s3133_s0 = inlined_call_operand.hbm [shape: f32[2,32,256], index: 0, kind: input, shape index: {}]   ;;  %s3134_s1 = inlined_call_operand.vmem [shape: f32[9,256], index: 1, kind: input, shape index: {}]   ;;  %s3135_s2 = inlined_call_operand.vmem [shape: f32[8,32], index: 2, kind: input, shape index: {}]   ;;  %s3136_s3 = inlined_call_operand.vmem [shape: f32[8,1], index: 3, kind: input, shape index: {}]   ;;  %s3137_s4 = inlined_call_operand.hbm [shape: f32[4,4,8,8], index: 4, kind: input, shape index: {}]   ;;  %s3138_s5 = inlined_call_operand.vmem [shape: f32[8,1], index: 5, kind: input, shape index: {}]   ;;  %s3139_s6 = inlined_call_operand.vmem [shape: f32[16,8], index: 6, kind: input, shape index: {}]   ;;  %s3140_s7 = inlined_call_operand.vmem [shape: f32[16,1], index: 7, kind: input, shape index: {}]   ;;  %s3141_s8 = inlined_call_operand.hbm [shape: f32[2,16,1024], index: 8, kind: output, shape index: {}]  }
   0x1   :  { %3148 = sst [smem:[#allocation13_spill]] %s3137_s4 }
   0x2   :  { %13 = vsyncpa [#allocation4], 0 }
   0x3   :  { %15 = vsyncpa [#allocation4 + $0x1], 0 }
   0x4   :  { %16 = vsyncpa [#allocation7], 0 }
   0x5   :  { %17 = vsyncpa [#allocation5], 0 }
   0x6   :  { %19 = vsyncpa [#allocation5 + $0x1], 0  ;;  %s2708_s27 = smov 0   ;;  %s2710_s28 = smov 0  }
   0x7   :  { %s2712_s29 = smov 0   ;;  %s2714_s30 = smov 0  }
   0x8 LB: > { %s2729_s9 = sadd.s32 4294967295, %s2642_s30   ;;  %s2391_s10 = sadd.s32 4294967294, %s2642_s30   ;;  %s2642_s30 = sphi %s2714_s30, %s3165_s30   ;;  %s2638_s29 = sphi %s2712_s29, %s3168_s29   ;;  %s2634_s28 = sphi %s2710_s28, %s3167_s28   ;;  %s2630_s27 = sphi %s2708_s27, %s3166_s27  }
   0x9   : > { %p45_p0 = scmp.ne.s32.totalorder %s2634_s28, %s2630_s27  ;;  %p3144_p1 = scmp.eq.s32.totalorder %s2729_s9, 0 }
   0xa   : > { %p222_p3 = scmp.eq.s32.totalorder %s2391_s10, 1  ;;  %p2392_p5 = scmp.ge.s32.totalorder %s2642_s30, 1 }
   0xb   : > { %p2738_p4 = por %p3144_p1, %p45_p0  ;;  %p229_p7 = scmp.lt.s32.totalorder %s2642_s30, 3 }
   0xc   : > { %p2743_p6 = por %p222_p3, %p45_p0  ;;  %s2644_s14 = smov [#allocation6]  }
   0xd   : > { %s3149_s11 = scalar_select %p2738_p4, 1, 0 }
   0xe   : > { %s3150_s12 = scalar_select %p2743_p6, 1, 0 }
   0xf   : > { %p2748_p8 = pnand %p2392_p5, %p229_p7  ;;  %s250_s15 = sshll.u32 %s2644_s14, 4  ;;  %s251_s15 = int_to_ptr.vmem [resolvable:$true] %s250_s15 }
  0x10   : > { %s2762_s17 = sadd.s32 1, %s2642_s30   ;;  %s32_s18 = sadd.s32 1, %s2638_s29 }
  0x11   : > { %s3151_s13 = scalar_select %p2748_p8, 1, 0 }
  0x12   : > { %p2453_p9 = pneg %p2748_p8  ;;  %3153 = sst [smem:[#allocation12_spill]] %s2762_s17 }
  0x13   : > { %s29_s19 = ssub.s32 %s2642_s30, %s2762_s17  ;;  %s2531_s20 = scalar_lea.vmem %s251_s15, 2048 }
  0x14   : > { %p2757_p11 = pnand %p2453_p9, %p3144_p1  ;;  %p2532_p13 = scmp.ne.s32.totalorder %s251_s15, %s2531_s20 }
  0x15   : > { %p2539_p5 = scmp.lt.s32.totalorder %s251_s15, %s251_s15  ;;  %p2540_p7 = scmp.lt.s32.totalorder %s2531_s20, %s2531_s20 }
  0x16   : > { %p2522_p12 = pneg %p2757_p11 }
  0x17   : > { %p2541_p10 = por %p2540_p7, %p2539_p5 }
  0x18   : > { %p2534_p0 = pnand %p2532_p13, %p2522_p12 }
  0x1a   : > { %p2535_p3 = pneg %p2534_p0 }
  0x1c   : > { %p2542_p2 = pnand %p2541_p10, %p2535_p3 }
  0x1e   : > { %2545 = shalt.err (!%p2542_p2)
}
  0x1f   : > { %s2645_s21 = smov 128   ;;  %s2646_s22 = smov 8  }
  0x20   : > { %s3154_s4 = sld [smem:[#allocation13_spill]]  ;;  %p30_p9 = scmp.eq.s32.totalorder %s29_s19, 0 }
  0x21   : > { %p39_p12 = scmp.ne.s32.totalorder %s2638_s29, %s2634_s28  ;;  %p40_p10 = scmp.eq.s32.totalorder %s2642_s30, 0 }
  0x22   : > { %p2466_p2 = scmp.lt.s32.totalorder %s2642_s30, 2  ;;  %p3155_p0 = scmp.eq.s32.totalorder %s2729_s9, 1 }
  0x23   : > { %s2779_s25 = scalar_select %p30_p9, %s2638_s29, %s32_s18  }
  0x24   : > { %p41_p13 = por %p40_p10, %p39_p12  ;;  %p2783_p3 = por %p3155_p0, %p39_p12 }
  0x25   : > { %s273_s10 = sand.u32 1, %s2638_s29   ;;  %s2443_s14 = sshll.u32 %s2642_s30, 10 }
  0x26   : > { %2456 = dma.hbm_to_vmem [thread:$0]  (!%p2757_p11), %s3154_s4, 2048, %s251_s15, [#allocation7], %s2645_s21, %s2645_s21, %s2646_s22  }
  0x27   : > { %s3156_s26 = scalar_select %p2783_p3, 1, 0 }
  0x28   : > { %s2395_s20 = sshll.u32 %s273_s10, 6  ;;  %s2792_s23 = scalar_lea.hbm %s3133_s0, %s2443_s14 }
  0x29   : > { %s277_s15 = scalar_lea.vmem [#allocation3], %s2395_s20  ;;  %p2794_p11 = pnand %p2466_p2, %p41_p13 }
  0x2a   : > { %s284_s18 = sshll.u32 %s277_s15, 4  ;;  %s2800_s21 = scalar_lea.sflag [#allocation4], %s273_s10  ;;  %s2798_s18 = int_to_ptr.vmem [resolvable:$true] %s284_s18 }
  0x2b   : > { %s2546_s22 = scalar_lea.hbm %s2792_s23, 1024  ;;  %p2548_p7 = pneg %p2794_p11 }
  0x2c   : > { %p2547_p5 = scmp.ne.s32.totalorder %s2792_s23, %s2546_s22  ;;  %s2551_s14 = scalar_lea.hbm %s3133_s0, 2048 }
  0x2d   : > { %p2552_p10 = scmp.lt.s32.totalorder %s2792_s23, %s3133_s0  ;;  %p2553_p2 = scmp.lt.s32.totalorder %s2551_s14, %s2546_s22 }
  0x2e   : > { %p2549_p9 = pnand %p2548_p7, %p2547_p5 }
  0x2f   : > { %p2554_p13 = por %p2553_p2, %p2552_p10 }
  0x30   : > { %p2550_p12 = pneg %p2549_p9 }
  0x32   : > { %p2555_p0 = pnand %p2554_p13, %p2550_p12 }
  0x34   : > { %2558 = shalt.err (!%p2555_p0)
}
  0x35   : > { %s2559_s10 = scalar_lea.vmem %s2798_s18, 1024  ;;  %s2647_s15 = smov [#allocation3]  }
  0x36   : > { %p2560_p1 = scmp.ne.s32.totalorder %s2798_s18, %s2559_s10  ;;  %s2564_s4 = sshll.u32 %s2647_s15, 4  ;;  %s2565_s4 = int_to_ptr.vmem [resolvable:$false] %s2564_s4 }
  0x37   : > { %s2566_s17 = scalar_lea.vmem %s2565_s4, 2048  ;;  %p2567_p9 = scmp.lt.s32.totalorder %s2798_s18, %s2565_s4 }
  0x38   : > { %p2562_p6 = pnand %p2560_p1, %p2548_p7  ;;  %p2568_p3 = scmp.lt.s32.totalorder %s2566_s17, %s2559_s10 }
  0x3a   : > { %p2563_p5 = pneg %p2562_p6  ;;  %p2569_p4 = por %p2568_p3, %p2567_p9 }
  0x3c   : > { %p2570_p8 = pnand %p2569_p4, %p2563_p5 }
  0x3e   : > { %2573 = shalt.err (!%p2570_p8)
}
  0x3f   : > { %s2648_s22 = smov 256   ;;  %s2649_s24 = smov 16  }
  0x40   : > { %2460 = dma.hbm_to_vmem [thread:$0]  (!%p2794_p11), %s2792_s23, 1024, %s2798_s18, %s2800_s21, %s2648_s22, %s2648_s22, %s2649_s24  }
  0x41   : > { %p3158_p1 = scmp.ne.s32.totalorder %s3151_s13, 0 }
  0x42   : > { %s2824_s14 = sand.u32 (!%p3158_p1), 1, %s2634_s28   ;;  %p3159_p4 = scmp.ne.s32.totalorder (!%p3158_p1), %s3149_s11, 0 }
  0x43   : > { %296 = sbr.rel (%p3158_p1) target bundleno = 862 (0x35e), region = 52  ;;  %s2399_s4 = sshll.u32 (!%p3158_p1), %s2824_s14, 6 }
  0x44   : > { %s299_s20 = scalar_lea.sflag (!%p3158_p1), [#allocation4], %s2824_s14  ;;  %s302_s16 = scalar_lea.vmem (!%p3158_p1), [#allocation3], %s2399_s4 }
  0x48   : > { %2617 = dma.done.wait (%p3159_p4), %s299_s20, 1024  }
  0x49   : > { %2619 = vsyncadd (%p3159_p4), %s299_s20, 4294966272  ;;  %p3160_p6 = scmp.eq.s32.totalorder %s2729_s9, 0 }
  0x4b   : > { %2621 = dma.done.wait (%p3160_p6), [#allocation7], 2048   ;;  %p3161_p8 = pmov %p3160_p6 }
  0x4c   : > { %v2650_v0 = vmov 0.0   ;;  %v2651_v1 = vmov 0   ;;  %v346_v2 = vld [vmem:[%s302_s16 + $0x38] sm:$0xff]  ;;  %v345_v3 = vld [vmem:[%s302_s16 + $0x30] sm:$0xff]  ;;  %v344_v4 = vld [vmem:[%s302_s16 + $0x28] sm:$0xff]  ;;  %vm354_vm0 = vcmask 261120   ;;  %v442_v22 = vlaneseq }
  0x4d   : > { %2623 = vsyncadd (%p3161_p8), [#allocation7], 4294965248  ;;  %422 = vmatprep.mubr.f32.mxu0 %v2650_v0  ;;  %2518 = vset.pattern.permute.xlu0 %v2651_v1  ;;  %v343_v5 = vld [vmem:[%s302_s16 + $0x20] sm:$0xff]  ;;  %v342_v6 = vld [vmem:[%s302_s16 + $0x18] sm:$0xff]  ;;  %s2652_s19 = smov 1   ;;  %s2653_s21 = smov 16  }
  0x4e   : > { %532 = vmatprep.mubr.f32.mxu1 %v2650_v0  ;;  %2519 = vset.pattern.permute.xlu1 %v2651_v1  ;;  %v341_v7 = vld [vmem:[%s302_s16 + $0x10] sm:$0xff]  ;;  %v348_v8 = vld [vmem:[%s3136_s3] sm:$0xff]  ;;  %v340_v9 = vld [vmem:[%s302_s16 + $0x8] sm:$0xff]  ;;  %s2654_s10 = smov 17   ;;  %s2655_s15 = smov 127   ;;  %v451_v23 = vshrl.u32 %v442_v22, 7 }
  0x4f   : > { %382 = vmatprep.subr.mxu0 %v346_v2  ;;  %351 = vperm.xlu0 %2518, %v348_v8   ;;  %v339_v10 = vld [vmem:[%s302_s16] sm:$0xff]  ;;  %s2656_s17 = smov 15   ;;  %s2657_s22 = smov 113   ;;  %v1937_v21 = vld [vmem:[%s3140_s7 + $0x8] sm:$0xff]  ;;  %v2874_v24 = vand.u32 127, %v442_v22  ;;  %vm464_vm3 = vcmask 64512  }
  0x50   : > { %383 = vmatpush1.msra.mxu0 %v345_v3  ;;  %v347_v11 = vld [vmem:[%s3135_s2] sm:$0xff]  ;;  %s2658_s24 = smov 112   ;;  %s2659_s4 = smov 111   ;;  %v2876_v25 = vsub.s32 0, %v451_v23  ;;  %v2878_v26 = vsub.s32 1, %v451_v23  ;;  %v463_v39 = vld [vmem:[#allocation6 + $0x8] sm:$0xff] }
  0x51   : > { %384 = vmatprep.subr.mxu0 %v344_v4  ;;  %v1936_v19 = vld [vmem:[%s3140_s7] sm:$0xff]  ;;  %vm444_vm1 = vcmp.lt.s32.totalorder %v2874_v24, 1  ;;  %vm617_vm2 = vcmp.lt.s32.totalorder %v2874_v24, 16  ;;  %vm717_vm4 = vcmp.lt.s32.totalorder %v2874_v24, 17  ;;  %vm822_vm5 = vcmp.lt.s32.totalorder %v2874_v24, 127  ;;  %v636_v61 = vld [vmem:[#allocation6 + $0x10] sm:$0xff] }
  0x52   : > { %385 = vmatpush1.msra.mxu0 %v343_v5  ;;  %v431_v20 = vld [vmem:[%s3138_s5] sm:$0xff]  ;;  %v735_v2 = vld [vmem:[#allocation6 + $0x18] sm:$0xff]  ;;  %vm996_vm6 = vcmp.lt.s32.totalorder %v2874_v24, 15  ;;  %vm1218_vm7 = vcmp.lt.s32.totalorder %v2874_v24, 113  ;;  %vm1194_vm8 = vcmp.lt.s32.totalorder %v2874_v24, 112  ;;  %vm1566_vm9 = vcmp.lt.s32.totalorder %v2874_v24, 111 }
  0x53   : > { %386 = vmatprep.subr.mxu0 %v342_v6  ;;  %v2403_v27 = vld [vmem:[%s3134_s1 + $0x3] ss:$8 sm:$0x3]  ;;  %v2406_v31 = vld [vmem:[%s3134_s1 + $0x1] ss:$8 sm:$0x3] }
  0x54   : > { %387 = vmatpush1.msra.mxu0 %v341_v7  ;;  %v457_v29 = vrot.slane %v2403_v27, %v2878_v26  ;;  %v453_v30 = vrot.slane %v2403_v27, %v2876_v25  ;;  %v630_v36 = vrot.slane %v2406_v31, %v2878_v26  ;;  %v720_v40 = vld [vmem:[%s3134_s1] ss:$8 sm:$0x3]  ;;  %v626_v42 = vrot.slane %v2406_v31, %v2876_v25  ;;  %v2409_v50 = vld [vmem:[%s3134_s1 + $0x5] ss:$8 sm:$0x3] }
  0x55   : > { %388 = vmatprep.subr.mxu0 %v340_v9  ;;  %v725_v47 = vrot.slane %v720_v40, %v2876_v25  ;;  %v729_v48 = vrot.slane %v720_v40, %v2878_v26  ;;  %v437_v49 = vld [vmem:[#allocation6] sm:$0xff]  ;;  %v831_v59 = vrot.slane %v2409_v50, %v2876_v25  ;;  %v835_v60 = vrot.slane %v2409_v50, %v2878_v26  ;;  %p3162_p11 = scmp.ne.s32.totalorder %s3156_s26, 0  ;;  %s2660_s20 = smov [#allocation8]  }
  0x56   : > { %389 = vmatpush1.msra.mxu0 %v339_v10  ;;  %v2414_v52 = vld [vmem:[%s3134_s1 + $0x1] ss:$8 sm:$0x3]  ;;  %v2412_v62 = vld [vmem:[%s3134_s1 + $0x2] ss:$8 sm:$0x3] }
  0x57   : > { %2402 = vmatmul.mubr.msk.f32.vlgmr.msra.gmra.mxu0 %vm354_vm0, %v347_v11  ;;  %v1101_v63 = vrot.slane %v2414_v52, %v2878_v26  ;;  %v1097_v3 = vrot.slane %v2414_v52, %v2876_v25  ;;  %v2417_v6 = vld [vmem:[%s3134_s1 + $0x6] ss:$8 sm:$0x3]  ;;  %v1005_v10 = vrot.slane %v2412_v62, %v2876_v25  ;;  %v1009_v11 = vrot.slane %v2412_v62, %v2878_v26  ;;  %v2424_v31 = vld [vmem:[%s3134_s1 + $0x7] ss:$8 sm:$0x3] }
  0x58   : > { %803 = vmatprep.mubr.f32.mxu0 %v2650_v0  ;;  %v1591_v52 = vrot.slane %v2424_v31, %v2876_v25  ;;  %v1585_v24 = vld [vmem:[#allocation6 + $0x60] sm:$0xff]  ;;  %s2578_s16 = sshll.u32 %s2660_s20, 4  ;;  %s2579_s16 = int_to_ptr.vmem [resolvable:$false] %s2578_s16 }
  0x59   : > { %s2580_s11 = scalar_lea.vmem %s2579_s16, 4096 }
  0xca   : > { %v352_v12 = vpop.permute.xlu0 %351 }
 0x117   : > { %v424_v13 = vpop.f32.mrf.mxu0 }
 0x118   : > { %v425_v14 = vadd.f32 %v424_v13, %v352_v12 }
 0x119   : > { %v426_v15 = vpop.f32.mrf.mxu0 }
 0x11a   : > { %v2845_v16 = vmax.f32 %v425_v14, 0.0  ;;  %v427_v17 = vadd.f32 %v426_v15, %v352_v12  ;;  %v843_v12 = vld [vmem:[#allocation6 + $0x28] sm:$0xff]  ;;  %v841_v15 = vld [vmem:[#allocation6 + $0x20] sm:$0xff] }
 0x11c   : > { %v2847_v18 = vmax.f32 %v427_v17, 0.0  ;;  %438 = vrot.lane.b32.xlu0 %v2845_v16, %s2652_s19  ;;  %v1227_v17 = vrot.slane %v2417_v6, %v2876_v25 }
 0x11e   : > { %440 = vrot.lane.b32.xlu1 %v2847_v18, %s2652_s19  ;;  %s2401_s19 = sshll.u32 %s2824_s14, 7 }
 0x120   : > { %615 = vrot.lane.b32.xlu0 %v2847_v18, %s2653_s21 }
 0x122   : > { %613 = vrot.lane.b32.xlu1 %v2845_v16, %s2653_s21  ;;  %s3065_s21 = scalar_lea.vmem [#allocation8], %s2401_s19 }
 0x124   : > { %715 = vrot.lane.b32.xlu0 %v2847_v18, %s2654_s10 }
 0x126   : > { %713 = vrot.lane.b32.xlu1 %v2845_v16, %s2654_s10  ;;  %s2444_s10 = sshll.u32 %s2729_s9, 11 }
 0x128   : > { %820 = vrot.lane.b32.xlu0 %v2847_v18, %s2655_s15 }
 0x12a   : > { %818 = vrot.lane.b32.xlu1 %v2845_v16, %s2655_s15  ;;  %s2308_s15 = sshll.u32 %s3065_s21, 4  ;;  %s3088_s15 = int_to_ptr.vmem [resolvable:$true] %s2308_s15 }
 0x12b   : > { %s2574_s9 = scalar_lea.vmem %s3088_s15, 2048  ;;  %p2581_p10 = scmp.lt.s32.totalorder %s3088_s15, %s2579_s16 }
 0x12c   : > { %994 = vrot.lane.b32.xlu0 %v2847_v18, %s2656_s17  ;;  %p2575_p3 = scmp.ne.s32.totalorder %s3088_s15, %s2574_s9  ;;  %p2582_p2 = scmp.lt.s32.totalorder %s2580_s11, %s2574_s9 }
 0x12e   : > { %992 = vrot.lane.b32.xlu1 %v2845_v16, %s2656_s17  ;;  %p2576_p7 = pnand %p2575_p3, %p3162_p11  ;;  %p2583_p13 = por %p2582_p2, %p2581_p10 }
 0x130   : > { %1216 = vrot.lane.b32.xlu0 %v2847_v18, %s2657_s22  ;;  %p2577_p12 = pneg %p2576_p7 }
 0x132   : > { %1214 = vrot.lane.b32.xlu1 %v2845_v16, %s2657_s22  ;;  %p2584_p0 = pnand %p2583_p13, %p2577_p12 }
 0x134   : > { %1192 = vrot.lane.b32.xlu0 %v2847_v18, %s2658_s24 }
 0x136   : > { %1190 = vrot.lane.b32.xlu1 %v2845_v16, %s2658_s24  ;;  %s3086_s24 = scalar_lea.hbm %s3141_s8, %s2444_s10 }
 0x138   : > { %1564 = vrot.lane.b32.xlu0 %v2847_v18, %s2659_s4 }
 0x13a   : > { %1562 = vrot.lane.b32.xlu1 %v2845_v16, %s2659_s4  ;;  %s2295_s4 = scalar_lea.sflag [#allocation5], %s2824_s14 }
 0x13c   : > { %1940 = vperm.xlu0 %2518, %v1936_v19  }
 0x13e   : > { %434 = vperm.xlu1 %2519, %v431_v20  }
 0x142   : > { %1945 = vperm.xlu1 %2519, %v1937_v21   ;;  %v1231_v21 = vrot.slane %v2417_v6, %v2878_v26 }
 0x18e   : > { %v439_v28 = vpop.permute.xlu0 %438 }
 0x190   : > { %v441_v32 = vpop.permute.xlu1 %440 }
 0x191   : > { %v2889_v33 = vsel %vm444_vm1, %v441_v32, %v439_v28  ;;  %v2891_v34 = vsel %vm444_vm1, %v439_v28, %v441_v32  ;;  %v2421_v32 = vld [vmem:[%s3134_s1 + $0x3] ss:$8 sm:$0x3] }
 0x192   : > { %v616_v35 = vpop.permute.xlu0 %615  ;;  %v461_v37 = vmul.f32 %v457_v29, %v2891_v34  ;;  %v460_v38 = vmul.f32 %v453_v30, %v2889_v33  ;;  %v2416_v29 = vld [vmem:[%s3134_s1 + $0x7] ss:$8 sm:$0x3]  ;;  %v1015_v30 = vld [vmem:[#allocation6 + $0x30] sm:$0xff] }
 0x193   : > { %v1203_v40 = vrot.slane %v2416_v29, %v2876_v25 }
 0x194   : > { %v614_v41 = vpop.permute.xlu1 %613  ;;  %498 = vmatprep.subr.mxu1 %v461_v37  ;;  %v2972_v37 = vld [vmem:[%s3134_s1 + $0x5] ss:$8 sm:$0x3] }
 0x195   : > { %v618_v43 = vsel %vm617_vm2, %v614_v41, %v616_v35  ;;  %499 = vmatpush1.msra.mxu1 %v460_v38  ;;  %v619_v44 = vsel %vm617_vm2, %v616_v35, %v614_v41  ;;  %v1759_v50 = vrot.slane %v2972_v37, %v2878_v26  ;;  %v1755_v62 = vrot.slane %v2972_v37, %v2876_v25 }
 0x196   : > { %v634_v45 = vmul.f32 %v630_v36, %v618_v43  ;;  %2404 = vmatmul.mubr.msk.f32.vlgmr.msra.gmra.mxu1 %vm464_vm3, %v463_v39  ;;  %v716_v46 = vpop.permute.xlu0 %715  ;;  %572 = vmatprep.subr.mxu1 %v2847_v18  ;;  %v633_v53 = vmul.f32 %v626_v42, %v619_v44  ;;  %v1105_v13 = vmul.f32 %v1101_v63, %v618_v43  ;;  %v1107_v36 = vld [vmem:[#allocation6 + $0x38] sm:$0xff] }
 0x197   : > { %606 = vmatprep.mubr.f32.mxu1 %v2650_v0  ;;  %573 = vmatpush1.msra.mxu1 %v2845_v16  ;;  %v1104_v22 = vmul.f32 %v1097_v3, %v619_v44  ;;  %v1207_v44 = vrot.slane %v2416_v29, %v2878_v26 }
 0x198   : > { %v714_v51 = vpop.permute.xlu1 %713  ;;  %670 = vmatprep.subr.mxu1 %v634_v45  ;;  %v1595_v45 = vrot.slane %v2424_v31, %v2878_v26 }
 0x199   : > { %v718_v54 = vsel %vm717_vm4, %v714_v51, %v716_v46  ;;  %v719_v55 = vsel %vm717_vm4, %v716_v46, %v714_v51  ;;  %v1237_v46 = vld [vmem:[#allocation6 + $0x48] sm:$0xff] }
 0x19a   : > { %v732_v56 = vmul.f32 %v725_v47, %v719_v55  ;;  %v733_v57 = vmul.f32 %v729_v48, %v718_v54  ;;  %2405 = vmatmul.mubr.msk.f32.vlgmr.msra.gmra.mxu1 %vm464_vm3, %v437_v49  ;;  %v821_v58 = vpop.permute.xlu0 %820  ;;  %v2423_v47 = vld [vmem:[%s3134_s1 + $0x10] ss:$8 sm:$0x3]  ;;  %v1469_v48 = vrot.slane %v2421_v32, %v2876_v25  ;;  %v1473_v49 = vrot.slane %v2421_v32, %v2878_v26 }
 0x19b   : > { %671 = vmatpush1.msra.mxu1 %v633_v53  ;;  %704 = vmatprep.mubr.f32.mxu1 %v2650_v0 }
 0x19c   : > { %877 = vmatprep.subr.mxu1 %v2847_v18  ;;  %v819_v1 = vpop.permute.xlu1 %818  ;;  %769 = vmatprep.subr.mxu0 %v733_v57 }
 0x19d   : > { %v2931_v4 = vsel %vm822_vm5, %v819_v1, %v821_v58  ;;  %v2935_v5 = vsel %vm822_vm5, %v821_v58, %v819_v1  ;;  %770 = vmatpush1.msra.mxu0 %v732_v56  ;;  %v1579_v58 = vrot.slane %v2423_v47, %v2878_v26  ;;  %v1575_v1 = vrot.slane %v2423_v47, %v2876_v25  ;;  %v1479_v25 = vld [vmem:[#allocation6 + $0x58] sm:$0xff] }
 0x19e   : > { %v838_v7 = vmul.f32 %v831_v59, %v2931_v4  ;;  %v839_v8 = vmul.f32 %v835_v60, %v2935_v5  ;;  %2407 = vmatmul.mubr.msk.f32.vlgmr.msra.gmra.mxu1 %vm464_vm3, %v636_v61  ;;  %v995_v9 = vpop.permute.xlu0 %994  ;;  %2408 = vmatmul.mubr.msk.f32.vlgmr.msra.gmra.mxu0 %vm464_vm3, %v735_v2  ;;  %v1213_v59 = vld [vmem:[#allocation6 + $0x40] sm:$0xff]  ;;  %v1387_v60 = vld [vmem:[#allocation6 + $0x50] sm:$0xff]  ;;  %v1476_v61 = vmul.f32 %v1469_v48, %v2889_v33 }
 0x19f   : > { %878 = vmatpush1.msra.mxu1 %v2845_v16  ;;  %911 = vmatprep.mubr.f32.mxu1 %v2650_v0  ;;  %v1477_v26 = vmul.f32 %v1473_v49, %v2891_v34  ;;  %v1763_v33 = vmul.f32 %v1759_v50, %v2935_v5  ;;  %v1601_v34 = vld [vmem:[#allocation6 + $0x68] sm:$0xff]  ;;  %v1762_v5 = vmul.f32 %v1755_v62, %v2931_v4  ;;  %v1843_v4 = vld [vmem:[#allocation6 + $0x78] sm:$0xff] }
 0x1a0   : > { %v993_v14 = vpop.permute.xlu1 %992  ;;  %951 = vmatprep.subr.mxu0 %v839_v8  ;;  %985 = vmatprep.mubr.f32.mxu0 %v2650_v0 }
 0x1a1   : > { %v997_v19 = vsel %vm996_vm6, %v993_v14, %v995_v9  ;;  %v998_v20 = vsel %vm996_vm6, %v995_v9, %v993_v14  ;;  %952 = vmatpush1.msra.mxu0 %v838_v7 }
 0x1a2   : > { %v1012_v23 = vmul.f32 %v1005_v10, %v998_v20  ;;  %v1013_v27 = vmul.f32 %v1009_v11, %v997_v19  ;;  %2410 = vmatmul.mubr.msk.f32.vlgmr.msra.gmra.mxu1 %vm464_vm3, %v843_v12  ;;  %1141 = vmatprep.subr.mxu0 %v1105_v13  ;;  %v1217_v28 = vpop.permute.xlu0 %1216  ;;  %v1765_v10 = vld [vmem:[#allocation6 + $0x70] sm:$0xff] }
 0x1a3   : > { %2411 = vmatmul.mubr.msk.f32.vlgmr.msra.gmra.mxu0 %vm464_vm3, %v841_v15  ;;  %1083 = vmatprep.mubr.f32.mxu1 %v2650_v0 }
 0x1a4   : > { %1142 = vmatpush1.msra.mxu0 %v1104_v22  ;;  %v1215_v35 = vpop.permute.xlu1 %1214  ;;  %1049 = vmatprep.subr.mxu1 %v1013_v27 }
 0x1a5   : > { %v1219_v38 = vsel %vm1218_vm7, %v1215_v35, %v1217_v28  ;;  %v1220_v39 = vsel %vm1218_vm7, %v1217_v28, %v1215_v35  ;;  %1050 = vmatpush1.msra.mxu1 %v1012_v23  ;;  %1175 = vmatprep.mubr.f32.mxu0 %v2650_v0 }
 0x1a6   : > { %v1234_v41 = vmul.f32 %v1227_v17, %v1219_v38  ;;  %v1235_v42 = vmul.f32 %v1231_v21, %v1220_v39  ;;  %2413 = vmatmul.mubr.msk.f32.vlgmr.msra.gmra.mxu1 %vm464_vm3, %v1015_v30  ;;  %v1193_v43 = vpop.permute.xlu0 %1192 }
 0x1a7   : > { %2415 = vmatmul.mubr.msk.f32.vlgmr.msra.gmra.mxu0 %vm464_vm3, %v1107_v36  ;;  %1305 = vmatprep.mubr.f32.mxu1 %v2650_v0 }
 0x1a8   : > { %v1191_v51 = vpop.permute.xlu1 %1190  ;;  %1271 = vmatprep.subr.mxu1 %v1235_v42  ;;  %1379 = vmatprep.mubr.f32.mxu0 %v2650_v0 }
 0x1a9   : > { %v1195_v53 = vsel %vm1194_vm8, %v1191_v51, %v1193_v43  ;;  %v1196_v54 = vsel %vm1194_vm8, %v1193_v43, %v1191_v51  ;;  %1272 = vmatpush1.msra.mxu1 %v1234_v41 }
 0x1aa   : > { %v1210_v55 = vmul.f32 %v1203_v40, %v1195_v53  ;;  %v1211_v56 = vmul.f32 %v1207_v44, %v1196_v54  ;;  %v1599_v57 = vmul.f32 %v1595_v45, %v1196_v54  ;;  %2418 = vmatmul.mubr.msk.f32.vlgmr.msra.gmra.mxu1 %vm464_vm3, %v1237_v46  ;;  %1421 = vmatprep.subr.mxu1 %v2847_v18  ;;  %v1565_v63 = vpop.permute.xlu0 %1564  ;;  %v3035_v45 = vld [vmem:[%s3139_s6] sm:$0xff] }
 0x1ab   : > { %1455 = vmatprep.mubr.f32.mxu1 %v2650_v0  ;;  %1422 = vmatpush1.msra.mxu1 %v2845_v16  ;;  %v1598_v3 = vmul.f32 %v1591_v52, %v1195_v53  ;;  %v1927_v53 = vld [vmem:[%s3139_s6 + $0x8] sm:$0xff] }
 0x1ac   : > { %v1563_v2 = vpop.permute.xlu1 %1562  ;;  %1345 = vmatprep.subr.mxu0 %v1211_v56  ;;  %1635 = vmatprep.subr.mxu1 %v1599_v57 }
 0x1ad   : > { %v1568_v6 = vsel %vm1566_vm9, %v1565_v63, %v1563_v2  ;;  %1346 = vmatpush1.msra.mxu0 %v1210_v55  ;;  %v1567_v7 = vsel %vm1566_vm9, %v1563_v2, %v1565_v63 }
 0x1ae   : > { %v1583_v8 = vmul.f32 %v1579_v58, %v1568_v6  ;;  %2419 = vmatmul.mubr.msk.f32.vlgmr.msra.gmra.mxu0 %vm464_vm3, %v1213_v59  ;;  %2420 = vmatmul.mubr.msk.f32.vlgmr.msra.gmra.mxu1 %vm464_vm3, %v1387_v60  ;;  %v1582_v9 = vmul.f32 %v1575_v1, %v1567_v7 }
 0x1af   : > { %1513 = vmatprep.subr.mxu0 %v1477_v26  ;;  %1636 = vmatpush1.msra.mxu1 %v1598_v3 }
 0x1b0   : > { %1514 = vmatpush1.msra.mxu0 %v1476_v61  ;;  %1799 = vmatprep.subr.mxu1 %v1763_v33 }
 0x1b1   : > { %1709 = vmatprep.subr.mxu0 %v1583_v8  ;;  %1547 = vmatprep.mubr.f32.mxu0 %v2650_v0 }
 0x1b2   : > { %1669 = vmatprep.mubr.f32.mxu1 %v2650_v0  ;;  %2422 = vmatmul.mubr.msk.f32.vlgmr.msra.gmra.mxu0 %vm464_vm3, %v1479_v25 }
 0x1b3   : > { %2425 = vmatmul.mubr.msk.f32.vlgmr.msra.gmra.mxu1 %vm464_vm3, %v1601_v34  ;;  %1710 = vmatpush1.msra.mxu0 %v1582_v9 }
 0x1b4   : > { %1800 = vmatpush1.msra.mxu1 %v1762_v5  ;;  %1877 = vmatprep.subr.mxu0 %v2847_v18 }
 0x1b5   : > { %1743 = vmatprep.mubr.f32.mxu0 %v2650_v0  ;;  %1833 = vmatprep.mubr.f32.mxu1 %v2650_v0 }
 0x1b6   : > { %2426 = vmatmul.mubr.msk.f32.vlgmr.msra.gmra.mxu0 %vm464_vm3, %v1585_v24 }
 0x1b7   : > { %2428 = vmatmul.mubr.msk.f32.vlgmr.msra.gmra.mxu1 %vm464_vm3, %v1765_v10  ;;  %1878 = vmatpush1.msra.mxu0 %v2845_v16 }
 0x1b8   : > { %1911 = vmatprep.mubr.f32.mxu0 %v2650_v0  ;;  %2018 = vmatprep.mubr.f32.mxu1 %v2650_v0 }
 0x1b9   : > { %v3028_v27 = vpop.permute.xlu1 %434 }
 0x1ba   : > { %2429 = vmatmul.mubr.msk.f32.vlgmr.msra.gmra.mxu0 %vm464_vm3, %v1843_v4 }
 0x1bb   : > { %2095 = vmatprep.mubr.f32.mxu0 %v2650_v0 }
 0x256   : > { %v534_v18 = vpop.f32.mrf.mxu1 }
 0x258   : > { %v536_v11 = vpop.f32.mrf.mxu1 }
 0x25a   : > { %v608_v12 = vpop.f32.mrf.mxu1 }
 0x25b   : > { %v609_v14 = vadd.f32 %v608_v12, %v534_v18 }
 0x25c   : > { %v610_v13 = vpop.f32.mrf.mxu1 }
 0x25d   : > { %v611_v17 = vadd.f32 %v610_v13, %v536_v11 }
 0x25e   : > { %v706_v15 = vpop.f32.mrf.mxu1  ;;  %v805_v20 = vpop.f32.mrf.mxu0 }
 0x25f   : > { %v711_v19 = vadd.f32 %v706_v15, %v609_v14 }
 0x260   : > { %v708_v21 = vpop.f32.mrf.mxu1  ;;  %v807_v23 = vpop.f32.mrf.mxu0 }
 0x261   : > { %v810_v16 = vadd.f32 %v805_v20, %v711_v19  ;;  %v712_v22 = vadd.f32 %v708_v21, %v611_v17 }
 0x262   : > { %v913_v28 = vpop.f32.mrf.mxu1 }
 0x263   : > { %v811_v29 = vadd.f32 %v807_v23, %v712_v22  ;;  %v987_v30 = vpop.f32.mrf.mxu0  ;;  %v812_v35 = vadd.f32 %v810_v16, %v3028_v27  ;;  %v1941_v23 = vpop.permute.xlu0 %1940 }
 0x264   : > { %v988_v31 = vadd.f32 %v987_v30, %v913_v28  ;;  %v915_v32 = vpop.f32.mrf.mxu1 }
 0x265   : > { %v989_v36 = vpop.f32.mrf.mxu0  ;;  %v813_v37 = vadd.f32 %v811_v29, %v3028_v27  ;;  %v814_v44 = vmax.f32 %v812_v35, 0.0 }
 0x266   : > { %v1085_v38 = vpop.f32.mrf.mxu1  ;;  %v990_v39 = vadd.f32 %v989_v36, %v915_v32  ;;  %v1946_v32 = vpop.permute.xlu1 %1945 }
 0x267   : > { %v1090_v40 = vadd.f32 %v1085_v38, %v988_v31  ;;  %v1177_v41 = vpop.f32.mrf.mxu0  ;;  %v815_v42 = vmax.f32 %v813_v37, 0.0 }
 0x268   : > { %v1087_v43 = vpop.f32.mrf.mxu1 }
 0x269   : > { %v1091_v46 = vadd.f32 %v1087_v43, %v990_v39  ;;  %v1182_v47 = vadd.f32 %v1177_v41, %v1090_v40  ;;  %1984 = vmatprep.subr.mxu1 %v815_v42  ;;  %v1179_v48 = vpop.f32.mrf.mxu0 }
 0x26a   : > { %v1307_v49 = vpop.f32.mrf.mxu1  ;;  %1985 = vmatpush1.msra.mxu1 %v814_v44 }
 0x26b   : > { %v1183_v50 = vadd.f32 %v1179_v48, %v1091_v46  ;;  %2430 = vmatmul.mubr.msk.f32.vlgmr.msra.gmra.mxu1 %vm464_vm3, %v3035_v45  ;;  %v1184_v51 = vadd.f32 %v1182_v47, %v3028_v27 }
 0x26c   : > { %v1309_v52 = vpop.f32.mrf.mxu1  ;;  %2024 = vmatprep.mubr.f32.mxu1 %v2650_v0 }
 0x26d   : > { %v1185_v54 = vadd.f32 %v1183_v50, %v3028_v27  ;;  %v1186_v59 = vmax.f32 %v1184_v51, 0.0 }
 0x26e   : > { %v1381_v55 = vpop.f32.mrf.mxu0  ;;  %v1457_v56 = vpop.f32.mrf.mxu1 }
 0x26f   : > { %v1187_v57 = vmax.f32 %v1185_v54, 0.0  ;;  %v1382_v58 = vadd.f32 %v1381_v55, %v1307_v49  ;;  %2431 = vmatmul.mubr.msk.f32.gmra.mxu1 %vm464_vm3, %v1927_v53 }
 0x270   : > { %v1383_v60 = vpop.f32.mrf.mxu0  ;;  %v1459_v61 = vpop.f32.mrf.mxu1  ;;  %2172 = vmatprep.mubr.f32.mxu1 %v2650_v0 }
 0x271   : > { %v1462_v62 = vadd.f32 %v1457_v56, %v1382_v58  ;;  %v1384_v63 = vadd.f32 %v1383_v60, %v1309_v52  ;;  %2061 = vmatprep.subr.mxu0 %v1187_v57 }
 0x272   : > { %v1549_v1 = vpop.f32.mrf.mxu0  ;;  %2062 = vmatpush1.msra.mxu0 %v1186_v59 }
 0x273   : > { %v1463_v2 = vadd.f32 %v1459_v61, %v1384_v63  ;;  %v1554_v26 = vadd.f32 %v1549_v1, %v1462_v62  ;;  %v1671_v3 = vpop.f32.mrf.mxu1  ;;  %2432 = vmatmul.mubr.msk.f32.vlgmr.msra.gmra.mxu0 %vm464_vm3, %v3035_v45 }
 0x274   : > { %v1551_v6 = vpop.f32.mrf.mxu0  ;;  %2101 = vmatprep.mubr.f32.mxu0 %v2650_v0 }
 0x275   : > { %v1555_v33 = vadd.f32 %v1551_v6, %v1463_v2  ;;  %v1673_v7 = vpop.f32.mrf.mxu1  ;;  %v1556_v8 = vadd.f32 %v1554_v26, %v3028_v27 }
 0x276   : > { %v1745_v25 = vpop.f32.mrf.mxu0 }
 0x277   : > { %v1557_v34 = vadd.f32 %v1555_v33, %v3028_v27  ;;  %v1746_v9 = vadd.f32 %v1745_v25, %v1671_v3  ;;  %v1835_v5 = vpop.f32.mrf.mxu1  ;;  %2433 = vmatmul.mubr.msk.f32.gmra.mxu0 %vm464_vm3, %v1927_v53  ;;  %v1558_v11 = vmax.f32 %v1556_v8, 0.0 }
 0x278   : > { %v1747_v24 = vpop.f32.mrf.mxu0  ;;  %2249 = vmatprep.mubr.f32.mxu0 %v2650_v0 }
 0x279   : > { %v1559_v10 = vmax.f32 %v1557_v34, 0.0  ;;  %v1840_v4 = vadd.f32 %v1835_v5, %v1746_v9  ;;  %v1748_v18 = vadd.f32 %v1747_v24, %v1673_v7  ;;  %v1837_v12 = vpop.f32.mrf.mxu1 }
 0x27a   : > { %v1913_v13 = vpop.f32.mrf.mxu0 }
 0x27b   : > { %v1841_v14 = vadd.f32 %v1837_v12, %v1748_v18  ;;  %v1918_v15 = vadd.f32 %v1913_v13, %v1840_v4  ;;  %2138 = vmatprep.subr.mxu1 %v1559_v10 }
 0x27c   : > { %v1915_v17 = vpop.f32.mrf.mxu0  ;;  %2139 = vmatpush1.msra.mxu1 %v1558_v11 }
 0x27d   : > { %v1919_v19 = vadd.f32 %v1915_v17, %v1841_v14  ;;  %2434 = vmatmul.mubr.msk.f32.vlgmr.msra.gmra.mxu1 %vm464_vm3, %v3035_v45  ;;  %v1920_v20 = vadd.f32 %v1918_v15, %v3028_v27 }
 0x27e   : > { %2178 = vmatprep.mubr.f32.mxu1 %v2650_v0 }
 0x27f   : > { %v1921_v21 = vadd.f32 %v1919_v19, %v3028_v27  ;;  %v1922_v22 = vmax.f32 %v1920_v20, 0.0 }
 0x281   : > { %v1923_v16 = vmax.f32 %v1921_v21, 0.0  ;;  %2435 = vmatmul.mubr.msk.f32.gmra.mxu1 %vm464_vm3, %v1927_v53 }
 0x283   : > { %2215 = vmatprep.subr.mxu0 %v1923_v16 }
 0x284   : > { %2216 = vmatpush1.msra.mxu0 %v1922_v22 }
 0x285   : > { %2436 = vmatmul.mubr.msk.f32.vlgmr.msra.gmra.mxu0 %vm464_vm3, %v3035_v45 }
 0x286   : > { %2255 = vmatprep.mubr.f32.mxu0 %v2650_v0 }
 0x289   : > { %2437 = vmatmul.mubr.msk.f32.gmra.mxu0 %vm464_vm3, %v1927_v53 }
 0x32b   : > { %v2020_v28 = vpop.f32.mrf.mxu1 }
 0x32c   : > { %v2021_v29 = vadd.f32 %v2020_v28, %v1941_v23 }
 0x32d   : > { %v2022_v30 = vpop.f32.mrf.mxu1 }
 0x32e   : > { %v2262_v31 = vmax.f32 %v2021_v29, 0.0  ;;  %v2023_v27 = vadd.f32 %v2022_v30, %v1941_v23 }
 0x32f   : > { %v2026_v35 = vpop.f32.mrf.mxu1 }
 0x330   : > { %2278 = vst [vmem:[%s3065_s21] sm:$0xff] %v2262_v31  ;;  %v2263_v0 = vmax.f32 %v2023_v27, 0.0  ;;  %v2027_v36 = vadd.f32 %v2026_v35, %v1946_v32 }
 0x331   : > { %v2028_v37 = vpop.f32.mrf.mxu1 }
 0x332   : > { %2279 = vst [vmem:[%s3065_s21 + $0x8] sm:$0xff] %v2263_v0  ;;  %v2270_v38 = vmax.f32 %v2027_v36, 0.0  ;;  %v2029_v39 = vadd.f32 %v2028_v37, %v1946_v32 }
 0x333   : > { %v2097_v40 = vpop.f32.mrf.mxu0 }
 0x334   : > { %2286 = vst [vmem:[%s3065_s21 + $0x40] sm:$0xff] %v2270_v38  ;;  %v2271_v41 = vmax.f32 %v2029_v39, 0.0  ;;  %v2098_v42 = vadd.f32 %v2097_v40, %v1941_v23 }
 0x335   : > { %v2099_v43 = vpop.f32.mrf.mxu0 }
 0x336   : > { %2287 = vst [vmem:[%s3065_s21 + $0x48] sm:$0xff] %v2271_v41  ;;  %v2264_v44 = vmax.f32 %v2098_v42, 0.0  ;;  %v2100_v45 = vadd.f32 %v2099_v43, %v1941_v23 }
 0x337   : > { %v2103_v46 = vpop.f32.mrf.mxu0 }
 0x338   : > { %2280 = vst [vmem:[%s3065_s21 + $0x10] sm:$0xff] %v2264_v44  ;;  %v2265_v47 = vmax.f32 %v2100_v45, 0.0  ;;  %v2104_v48 = vadd.f32 %v2103_v46, %v1946_v32 }
 0x339   : > { %v2105_v49 = vpop.f32.mrf.mxu0 }
 0x33a   : > { %2281 = vst [vmem:[%s3065_s21 + $0x18] sm:$0xff] %v2265_v47  ;;  %v2272_v50 = vmax.f32 %v2104_v48, 0.0  ;;  %v2106_v51 = vadd.f32 %v2105_v49, %v1946_v32 }
 0x33c   : > { %2288 = vst [vmem:[%s3065_s21 + $0x50] sm:$0xff] %v2272_v50  ;;  %v2273_v52 = vmax.f32 %v2106_v51, 0.0 }
 0x33d   : > { %v2174_v53 = vpop.f32.mrf.mxu1 }
 0x33e   : > { %2289 = vst [vmem:[%s3065_s21 + $0x58] sm:$0xff] %v2273_v52  ;;  %v2175_v54 = vadd.f32 %v2174_v53, %v1941_v23 }
 0x33f   : > { %v2176_v55 = vpop.f32.mrf.mxu1 }
 0x340   : > { %v2266_v56 = vmax.f32 %v2175_v54, 0.0  ;;  %v2177_v57 = vadd.f32 %v2176_v55, %v1941_v23 }
 0x341   : > { %v2180_v58 = vpop.f32.mrf.mxu1 }
 0x342   : > { %2282 = vst [vmem:[%s3065_s21 + $0x20] sm:$0xff] %v2266_v56  ;;  %v2267_v59 = vmax.f32 %v2177_v57, 0.0  ;;  %v2181_v60 = vadd.f32 %v2180_v58, %v1946_v32 }
 0x343   : > { %v2182_v61 = vpop.f32.mrf.mxu1 }
 0x344   : > { %2283 = vst [vmem:[%s3065_s21 + $0x28] sm:$0xff] %v2267_v59  ;;  %v2274_v62 = vmax.f32 %v2181_v60, 0.0  ;;  %v2183_v63 = vadd.f32 %v2182_v61, %v1946_v32 }
 0x345   : > { %v2251_v1 = vpop.f32.mrf.mxu0 }
 0x346   : > { %2290 = vst [vmem:[%s3065_s21 + $0x60] sm:$0xff] %v2274_v62  ;;  %v2275_v2 = vmax.f32 %v2183_v63, 0.0  ;;  %v2252_v26 = vadd.f32 %v2251_v1, %v1941_v23 }
 0x347   : > { %v2253_v3 = vpop.f32.mrf.mxu0 }
 0x348   : > { %2291 = vst [vmem:[%s3065_s21 + $0x68] sm:$0xff] %v2275_v2  ;;  %v2268_v6 = vmax.f32 %v2252_v26, 0.0  ;;  %v2254_v33 = vadd.f32 %v2253_v3, %v1941_v23 }
 0x349   : > { %v2257_v7 = vpop.f32.mrf.mxu0 }
 0x34a   : > { %2284 = vst [vmem:[%s3065_s21 + $0x30] sm:$0xff] %v2268_v6  ;;  %v2269_v8 = vmax.f32 %v2254_v33, 0.0  ;;  %v2258_v25 = vadd.f32 %v2257_v7, %v1946_v32 }
 0x34b   : > { %v2259_v34 = vpop.f32.mrf.mxu0 }
 0x34c   : > { %2285 = vst [vmem:[%s3065_s21 + $0x38] sm:$0xff] %v2269_v8  ;;  %v2276_v9 = vmax.f32 %v2258_v25, 0.0  ;;  %v2260_v5 = vadd.f32 %v2259_v34, %v1946_v32 }
 0x34e   : > { %2292 = vst [vmem:[%s3065_s21 + $0x70] sm:$0xff] %v2276_v9  ;;  %v2277_v24 = vmax.f32 %v2260_v5, 0.0 }
 0x350   : > { %2293 = vst [vmem:[%s3065_s21 + $0x78] sm:$0xff] %v2277_v24 }
 0x351   : > { %2587 = shalt.err (!%p2584_p0)
}
 0x352   : > { %s2588_s13 = scalar_lea.hbm %s3086_s24, 2048  ;;  %s2592_s19 = scalar_lea.hbm %s3141_s8, 4096 }
 0x353   : > { %p2589_p5 = scmp.ne.s32.totalorder %s3086_s24, %s2588_s13  ;;  %p2593_p4 = scmp.lt.s32.totalorder %s3086_s24, %s3141_s8 }
 0x354   : > { %p2594_p6 = scmp.lt.s32.totalorder %s2592_s19, %s2588_s13 }
 0x355   : > { %p2590_p9 = pnand %p2589_p5, %p3162_p11 }
 0x356   : > { %p2595_p8 = por %p2594_p6, %p2593_p4 }
 0x357   : > { %p2591_p1 = pneg %p2590_p9 }
 0x359   : > { %p2596_p3 = pnand %p2595_p8, %p2591_p1 }
 0x35b   : > { %2599 = shalt.err (!%p2596_p3)
}
 0x35c   : > { %s2661_s17 = smov 1024   ;;  %s2662_s22 = smov 64  }
 0x35d   : > { %2451 = dma.vmem_to_hbm [thread:$0]  (%p3162_p11), %s3088_s15, 2048, %s3086_s24, %s2295_s4, %s2661_s17, %s2661_s17, %s2662_s22  }
 0x35e PF: > { %s2323_s9 = sand.u32 1, %s2630_s27   ;;  %p3163_p7 = scmp.ne.s32.totalorder %s3150_s12, 0 }
 0x35f   : > { %p3164_p12 = scmp.ge.s32.totalorder %s2642_s30, 2  ;;  %s2324_s20 = scalar_lea.sflag [#allocation5], %s2323_s9 }
 0x361   : > { %p2462_p10 = pnand %p3164_p12, %p3163_p7 }
 0x363   : > { %p2463_p2 = pneg %p2462_p10 }
 0x365   : > { %2625 = dma.done.wait (%p2463_p2), %s2324_s20, 2048  }
 0x366   : > { %2627 = vsyncadd (%p2463_p2), %s2324_s20, 4294965248  ;;  %s3165_s30 = sld [smem:[#allocation12_spill]]  ;;  %s3166_s27 = smov %s2634_s28 }
 0x367   : > { %s3167_s28 = smov %s2638_s29  ;;  %s3168_s29 = smov %s2779_s25 }
 0x36c   : > { %p22_p13 = scmp.ge.s32.totalorder %s3165_s30, 4  }
 0x36e   :  { %24 = sbr.rel (!%p22_p13) target bundleno = 8 (0x8), region = 123 }
 0x373   :  { %2329 = vsyncpa [#allocation4], 1 }
 0x374   :  { %2331 = vsyncpa [#allocation4 + $0x1], 1 }
 0x375   :  { %2332 = vsyncpa [#allocation7], 1 }
 0x376   :  { %2333 = vsyncpa [#allocation5], 1 }
 0x377   :  { %2335 = vsyncpa [#allocation5 + $0x1], 1 }

</bundles_post_ra>
